<compile_context>
chip_gen: v7x
topology: tpu7x:2x2x1
jax: 0.10.0
libtpu: 0.0.40
codegen_flags: <defaults>
</compile_context>

<pallas_src>
import functools

import jax
import jax.numpy as jnp
from jax.experimental import pallas as pl
from jax.experimental.pallas import tpu as pltpu


_VMEM_LIMIT = 48 * 1024 * 1024  # within v7x's 64 MiB per-TC VMEM


def _sigmoid(x):
    # hand-rolled to keep the in-kernel op set minimal (exp + div -> EUP/VPU)
    return 1.0 / (1.0 + jnp.exp(-x))


def _pick_tile(dim, align, cap):
    """Largest divisor of `dim` that is a multiple of `align` and <= cap,
    falling back to the full extent when `dim` is not `align`-aligned."""
    if dim % align != 0:
        return dim  # full-extent block (allowed when equal to array dim)
    t = align
    while t * 2 <= min(dim, cap) and dim % (t * 2) == 0:
        t *= 2
    return t


# ---------------------------------------------------------------------------
# Kernel 1: batched input projection  xw = x2d @ w_t + b   (all timesteps)
# ---------------------------------------------------------------------------
def _matmul_bias_kernel(x_ref, w_ref, b_ref, o_ref, acc_ref):
    @pl.when(pl.program_id(2) == 0)
    def _():
        acc_ref[...] = jnp.zeros_like(acc_ref)

    acc_ref[...] += jnp.dot(
        x_ref[...], w_ref[...], preferred_element_type=jnp.float32
    )

    @pl.when(pl.program_id(2) == pl.num_programs(2) - 1)
    def _():
        o_ref[...] = (acc_ref[...] + b_ref[...].astype(jnp.float32)).astype(
            o_ref.dtype
        )


def _input_projection(x2d, w_t, b2d):
    """x2d: (M, K), w_t: (K, N), b2d: (1, N) -> (M, N) float32."""
    M, K = x2d.shape
    N = w_t.shape[1]
    tm = _pick_tile(M, 8, 256)
    tn = _pick_tile(N, 128, 1024)
    tk = _pick_tile(K, 128, 2048)
    grid = (M // tm, N // tn, K // tk)
    return pl.pallas_call(
        _matmul_bias_kernel,
        out_shape=jax.ShapeDtypeStruct((M, N), jnp.float32),
        grid_spec=pltpu.PrefetchScalarGridSpec(
            num_scalar_prefetch=0,
            grid=grid,
            in_specs=[
                pl.BlockSpec((tm, tk), lambda i, j, k: (i, k)),
                pl.BlockSpec((tk, tn), lambda i, j, k: (k, j)),
                pl.BlockSpec((1, tn), lambda i, j, k: (0, j)),
            ],
            out_specs=pl.BlockSpec((tm, tn), lambda i, j, k: (i, j)),
            scratch_shapes=[pltpu.VMEM((tm, tn), jnp.float32)],
        ),
        compiler_params=pltpu.CompilerParams(
            dimension_semantics=("parallel", "parallel", "arbitrary"),
            vmem_limit_bytes=_VMEM_LIMIT,
        ),
    )(x2d, w_t, b2d)


# ---------------------------------------------------------------------------
# Kernel 2: sequential LSTM recurrence over T (state carried in VMEM scratch)
# ---------------------------------------------------------------------------
def _lstm_recurrence_kernel(
    xw_ref, whh_ref, h0_ref, c0_ref, y_ref, hn_ref, cn_ref, h_sc, c_sc, *, hidden
):
    t = pl.program_id(0)

    @pl.when(t == 0)
    def _():
        h_sc[...] = h0_ref[...].astype(jnp.float32)
        c_sc[...] = c0_ref[...].astype(jnp.float32)

    # gates = x_t @ W_ih^T + b  (precomputed)  +  h_{t-1} @ W_hh^T
    gates = xw_ref[0].astype(jnp.float32) + jnp.dot(
        h_sc[...], whh_ref[...], preferred_element_type=jnp.float32
    )
    H = hidden
    i_g = _sigmoid(gates[:, 0 * H : 1 * H])
    f_g = _sigmoid(gates[:, 1 * H : 2 * H])
    g_g = jnp.tanh(gates[:, 2 * H : 3 * H])
    o_g = _sigmoid(gates[:, 3 * H : 4 * H])

    c_new = f_g * c_sc[...] + i_g * g_g
    h_new = o_g * jnp.tanh(c_new)
    c_sc[...] = c_new
    h_sc[...] = h_new
    y_ref[0] = h_new.astype(y_ref.dtype)

    @pl.when(t == pl.num_programs(0) - 1)
    def _():
        hn_ref[...] = h_sc[...].astype(hn_ref.dtype)
        cn_ref[...] = c_sc[...].astype(cn_ref.dtype)


def _lstm_recurrence(xw_tbg, whh_t, h0, c0):
    """xw_tbg: (T, B, 4H) precomputed gates; whh_t: (H, 4H); h0/c0: (B, H)."""
    T, B, G4 = xw_tbg.shape
    H = whh_t.shape[0]
    kernel = functools.partial(_lstm_recurrence_kernel, hidden=H)
    y, h_n, c_n = pl.pallas_call(
        kernel,
        out_shape=(
            jax.ShapeDtypeStruct((T, B, H), h0.dtype),
            jax.ShapeDtypeStruct((B, H), h0.dtype),
            jax.ShapeDtypeStruct((B, H), h0.dtype),
        ),
        grid_spec=pltpu.PrefetchScalarGridSpec(
            num_scalar_prefetch=0,
            grid=(T,),
            in_specs=[
                pl.BlockSpec((1, B, G4), lambda t: (t, 0, 0)),   # streamed gates
                pl.BlockSpec((H, G4), lambda t: (0, 0)),          # resident W_hh^T
                pl.BlockSpec((B, H), lambda t: (0, 0)),           # resident h0
                pl.BlockSpec((B, H), lambda t: (0, 0)),           # resident c0
            ],
            out_specs=(
                pl.BlockSpec((1, B, H), lambda t: (t, 0, 0)),
                pl.BlockSpec((B, H), lambda t: (0, 0)),
                pl.BlockSpec((B, H), lambda t: (0, 0)),
            ),
            scratch_shapes=[
                pltpu.VMEM((B, H), jnp.float32),  # h state
                pltpu.VMEM((B, H), jnp.float32),  # c state
            ],
        ),
        compiler_params=pltpu.CompilerParams(
            dimension_semantics=("arbitrary",),  # sequential recurrence
            vmem_limit_bytes=_VMEM_LIMIT,
        ),
    )(xw_tbg, whh_t, h0, c0)
    return y, h_n, c_n


# ---------------------------------------------------------------------------
# LSTMBlock.forward
# ---------------------------------------------------------------------------
def lstm_block_forward(x, params, d_model):
    """JAX/Pallas equivalent of LSTMBlock.forward.

    params: dict with
      'w_ih_t': (E, 4H)   (= weight_ih_l0.T, gate order i,f,g,o)
      'w_hh_t': (H, 4H)   (= weight_hh_l0.T)
      'b'     : (1, 4H)   (= bias_ih_l0 + bias_hh_l0)
    Returns (output (B,T,H), (h_n (1,B,H), c_n (1,B,H))).
    """
    if isinstance(x, tuple) and x[0].shape[2] == d_model:
        inp, (h0, c0) = x[0], x[1]
    elif isinstance(x, tuple):
        inp, h0, c0 = x[0], None, None
    else:
        inp, h0, c0 = x, None, None

    B, T, E = inp.shape
    H = d_model
    if h0 is None:
        h0 = jnp.zeros((B, H), inp.dtype)
        c0 = jnp.zeros((B, H), inp.dtype)
    else:
        h0 = h0.reshape(B, H)  # accept PyTorch-style (1, B, H)
        c0 = c0.reshape(B, H)

    w_ih_t = params["w_ih_t"]
    w_hh_t = params["w_hh_t"]
    b2d = params["b"]

    # glue: time-major layout so every kernel block is full-extent/lane-dense.
    x_tbe = jnp.transpose(inp, (1, 0, 2)).reshape(T * B, E)
    xw = _input_projection(x_tbe, w_ih_t, b2d)          # (T*B, 4H) f32
    xw = xw.reshape(T, B, 4 * H)

    y_tbh, h_n, c_n = _lstm_recurrence(xw, w_hh_t, h0, c0)
    y = jnp.transpose(y_tbh, (1, 0, 2))                  # batch_first output
    # TODO(synk): nn.LSTM inter-layer dropout is a no-op for num_layers=1 and
    # self.dropout is unused in forward, so no dropout is applied here.
    return y, (h_n[None], c_n[None])


# ---------------------------------------------------------------------------
# Pure-JAX reference (mirrors torch.nn.LSTM equations, gate order i,f,g,o)
# ---------------------------------------------------------------------------
def _lstm_reference(x, h0, c0, w_ih_t, w_hh_t, b):
    B, T, E = x.shape
    H = h0.shape[-1]
    hp = jax.lax.Precision.HIGHEST
    h, c = h0.astype(jnp.float32), c0.astype(jnp.float32)
    ys = []
    for t in range(T):
        gates = (
            jnp.dot(x[:, t, :].astype(jnp.float32), w_ih_t, precision=hp)
            + jnp.dot(h, w_hh_t, precision=hp)
            + b
        )
        i_g = _sigmoid(gates[:, 0:H])
        f_g = _sigmoid(gates[:, H : 2 * H])
        g_g = jnp.tanh(gates[:, 2 * H : 3 * H])
        o_g = _sigmoid(gates[:, 3 * H : 4 * H])
        c = f_g * c + i_g * g_g
        h = o_g * jnp.tanh(c)
        ys.append(h)
    return jnp.stack(ys, axis=1), h, c


if __name__ == "__main__":
    key = jax.random.PRNGKey(0)
    B, T, E, H = 2, 8, 32, 128  # batch, seq, emb_len, d_model (small)
    k1, k2, k3, k4, k5, k6, k7, k8 = jax.random.split(key, 8)
    scale = 1.0 / jnp.sqrt(jnp.float32(H))

    x = jax.random.normal(k1, (B, T, E), jnp.float32)
    w_ih_t = jax.random.normal(k2, (E, 4 * H), jnp.float32) * scale
    w_hh_t = jax.random.normal(k3, (H, 4 * H), jnp.float32) * scale
    b_ih = jax.random.normal(k4, (4 * H,), jnp.float32) * scale
    b_hh = jax.random.normal(k5, (4 * H,), jnp.float32) * scale
    params = {
        "w_ih_t": w_ih_t,
        "w_hh_t": w_hh_t,
        "b": (b_ih + b_hh).reshape(1, 4 * H),
    }

    # ----- branch 1: plain tensor input (no initial state) -----
    y, (h_n, c_n) = lstm_block_forward(x, params, d_model=H)
    y = jax.block_until_ready(y)

    y_ref, h_ref, c_ref = _lstm_reference(
        x, jnp.zeros((B, H), jnp.float32), jnp.zeros((B, H), jnp.float32),
        w_ih_t, w_hh_t, b_ih + b_hh,
    )
    assert y.shape == (B, T, H)
    assert h_n.shape == (1, B, H) and c_n.shape == (1, B, H)
    assert jnp.allclose(y, y_ref, atol=1e-2, rtol=1e-2)
    assert jnp.allclose(h_n[0], h_ref, atol=1e-2, rtol=1e-2)
    assert jnp.allclose(c_n[0], c_ref, atol=1e-2, rtol=1e-2)

    # ----- branch 2: tuple input with initial state (requires E == d_model) ---
    x2 = jax.random.normal(k6, (B, T, H), jnp.float32)
    w_ih_t2 = jax.random.normal(k7, (H, 4 * H), jnp.float32) * scale
    params2 = {"w_ih_t": w_ih_t2, "w_hh_t": w_hh_t, "b": params["b"]}
    h0 = jax.random.normal(k8, (1, B, H), jnp.float32) * 0.1
    c0 = jnp.zeros((1, B, H), jnp.float32)

    y2, (h_n2, c_n2) = lstm_block_forward((x2, (h0, c0)), params2, d_model=H)
    y2 = jax.block_until_ready(y2)

    y2_ref, h2_ref, c2_ref = _lstm_reference(
        x2, h0[0], c0[0], w_ih_t2, w_hh_t, b_ih + b_hh
    )
    assert jnp.allclose(y2, y2_ref, atol=1e-2, rtol=1e-2)
    assert jnp.allclose(h_n2[0], h2_ref, atol=1e-2, rtol=1e-2)
    assert jnp.allclose(c_n2[0], c2_ref, atol=1e-2, rtol=1e-2)

    print("KERNEL_OK")
</pallas_src>

<mosaic_0001>
module attributes {stable_mosaic.version = 11 : i64} {
  func.func @_matmul_bias_kernel(%arg0: i32, %arg1: i32, %arg2: i32, %arg3: memref<16x32xf32, #tpu.memory_space<vmem>>, %arg4: memref<32x512xf32, #tpu.memory_space<vmem>>, %arg5: memref<1x512xf32, #tpu.memory_space<vmem>>, %arg6: memref<16x512xf32, #tpu.memory_space<vmem>>, %arg7: memref<16x512xf32, #tpu.memory_space<vmem>>) attributes {dimension_semantics = [#tpu.dimension_semantics<parallel>, #tpu.dimension_semantics<parallel>, #tpu.dimension_semantics<arbitrary>], iteration_bounds = array<i64: 1, 1, 1>, scalar_prefetch = 0 : i64, scratch_operands = 1 : i64, tpu.core_type = #tpu.core_type<tc>, window_params = [{transform_indices = @transform_0, window_bounds = array<i64: 16, 32>}, {transform_indices = @transform_1, window_bounds = array<i64: 32, 512>}, {transform_indices = @transform_2, window_bounds = array<i64: 1, 512>}, {transform_indices = @transform_3, window_bounds = array<i64: 16, 512>}]} {
    %c0_i32 = arith.constant 0 : i32
    %0 = arith.cmpi eq, %arg2, %c0_i32 : i32
    %1 = arith.extui %0 : i1 to i32
    %c0_i32_0 = arith.constant 0 : i32
    %2 = arith.cmpi ne, %1, %c0_i32_0 : i32
    scf.if %2 {
      %cst_10 = arith.constant 0.000000e+00 : f32
      %12 = vector.broadcast %cst_10 : f32 to vector<16x512xf32>
      %c0_11 = arith.constant 0 : index
      %c0_12 = arith.constant 0 : index
      %13 = vector.load %arg7[%c0_11, %c0_12] : memref<16x512xf32, #tpu.memory_space<vmem>>, vector<16x512xf32>
      tpu.vector_store %arg7[%c0_11, %c0_12], %12 {strides = array<i32>} : memref<16x512xf32, #tpu.memory_space<vmem>>, vector<16x512xf32>,
    } else {
    }
    %c0 = arith.constant 0 : index
    %c0_1 = arith.constant 0 : index
    %3 = vector.load %arg7[%c0, %c0_1] : memref<16x512xf32, #tpu.memory_space<vmem>>, vector<16x512xf32>
    %c0_2 = arith.constant 0 : index
    %c0_3 = arith.constant 0 : index
    %4 = vector.load %arg3[%c0_2, %c0_3] : memref<16x32xf32, #tpu.memory_space<vmem>>, vector<16x32xf32>
    %c0_4 = arith.constant 0 : index
    %c0_5 = arith.constant 0 : index
    %5 = vector.load %arg4[%c0_4, %c0_5] : memref<32x512xf32, #tpu.memory_space<vmem>>, vector<32x512xf32>
    %cst = arith.constant dense<0.000000e+00> : vector<16x512xf32>
    %6 = tpu.matmul %4, %5, %cst {dimension_numbers = #tpu.dot_dimension_numbers<[1], [0], [0], [1], [0, 0, 1, 1], [], []>} : vector<16x32xf32>, vector<32x512xf32>, vector<16x512xf32> -> vector<16x512xf32>
    %7 = arith.addf %3, %6 : vector<16x512xf32>
    %c0_6 = arith.constant 0 : index
    %c0_7 = arith.constant 0 : index
    %8 = vector.load %arg7[%c0_6, %c0_7] : memref<16x512xf32, #tpu.memory_space<vmem>>, vector<16x512xf32>
    tpu.vector_store %arg7[%c0_6, %c0_7], %7 {strides = array<i32>} : memref<16x512xf32, #tpu.memory_space<vmem>>, vector<16x512xf32>,
    %c0_i32_8 = arith.constant 0 : i32
    %9 = arith.cmpi eq, %arg2, %c0_i32_8 : i32
    %10 = arith.extui %9 : i1 to i32
    %c0_i32_9 = arith.constant 0 : i32
    %11 = arith.cmpi ne, %10, %c0_i32_9 : i32
    scf.if %11 {
      %c0_10 = arith.constant 0 : index
      %c0_11 = arith.constant 0 : index
      %12 = vector.load %arg7[%c0_10, %c0_11] : memref<16x512xf32, #tpu.memory_space<vmem>>, vector<16x512xf32>
      %c0_12 = arith.constant 0 : index
      %c0_13 = arith.constant 0 : index
      %13 = vector.load %arg5[%c0_12, %c0_13] : memref<1x512xf32, #tpu.memory_space<vmem>>, vector<1x512xf32>
      %14 = vector.broadcast %13 : vector<1x512xf32> to vector<16x512xf32>
      %15 = arith.addf %12, %14 : vector<16x512xf32>
      %c0_14 = arith.constant 0 : index
      %c0_15 = arith.constant 0 : index
      %16 = vector.load %arg6[%c0_14, %c0_15] : memref<16x512xf32, #tpu.memory_space<vmem>>, vector<16x512xf32>
      tpu.vector_store %arg6[%c0_14, %c0_15], %15 {strides = array<i32>} : memref<16x512xf32, #tpu.memory_space<vmem>>, vector<16x512xf32>,
    } else {
    }
    return
  }
  func.func @transform_0(%arg0: i32, %arg1: i32, %arg2: i32) -> (i32, i32) {
    %c0_i32 = arith.constant 0 : i32
    return %arg0, %arg2 : i32, i32
  }
  func.func @transform_1(%arg0: i32, %arg1: i32, %arg2: i32) -> (i32, i32) {
    %c0_i32 = arith.constant 0 : i32
    return %arg2, %arg1 : i32, i32
  }
  func.func @transform_2(%arg0: i32, %arg1: i32, %arg2: i32) -> (i32, i32) {
    %c0_i32 = arith.constant 0 : i32
    %c0_i32_0 = arith.constant 0 : i32
    return %c0_i32, %arg1 : i32, i32
  }
  func.func @transform_3(%arg0: i32, %arg1: i32, %arg2: i32) -> (i32, i32) {
    %c0_i32 = arith.constant 0 : i32
    return %arg0, %arg1 : i32, i32
  }
}

</mosaic_0001>

<bundles_post_ra>
// kernel: tpu_custom_call.1
= control target key start
LH: loop header
LB: loop body
LE: loop exit
PB: predicated region body
PF: predicated region fallthrough
CT: control target
= control target key end

     0   :  { %8 = vsyncpa [#allocation4], 0  ;;  %s498_s0 = inlined_call_operand.hbm [shape: f32[16,32], index: 0, kind: input, shape index: {}]   ;;  %s499_s1 = inlined_call_operand.hbm [shape: f32[32,512], index: 1, kind: input, shape index: {}]   ;;  %s500_s2 = inlined_call_operand.vmem [shape: f32[1,512], index: 2, kind: input, shape index: {}]   ;;  %s501_s3 = inlined_call_operand.hbm [shape: f32[16,512], index: 3, kind: output, shape index: {}]  }
   0x1   :  { %9 = vsyncpa [#allocation7], 0 }
   0x2   :  { %10 = vsyncpa [#allocation5], 0  ;;  %s425_s12 = smov [#allocation3]   ;;  %s353_s16 = scalar_lea.hbm %s498_s0, 256 }
   0x3   :  { %s16_s13 = sshll.u32 %s425_s12, 4  ;;  %p354_p0 = scmp.ne.s32.totalorder %s498_s0, %s353_s16  ;;  %s17_s13 = int_to_ptr.vmem [resolvable:$true] %s16_s13 }
   0x4   :  { %p357_p1 = scmp.lt.u32.totalorder %s353_s16, %s498_s0 }
   0x6   :  { %p359_p2 = pnand %p357_p1, %p354_p0 }
   0x8   :  { %362 = shalt.err (!%p359_p2)
}
   0x9   :  { %s363_s21 = scalar_lea.vmem %s17_s13, 256  ;;  %p368_p4 = scmp.lt.s32.totalorder %s17_s13, %s17_s13 }
   0xa   :  { %p364_p3 = scmp.ne.s32.totalorder %s17_s13, %s363_s21  ;;  %p369_p5 = scmp.lt.s32.totalorder %s363_s21, %s363_s21 }
   0xc   :  { %p370_p6 = por %p369_p5, %p368_p4 }
   0xe   :  { %p371_p7 = pnand %p370_p6, %p364_p3 }
  0x10   :  { %374 = shalt.err (!%p371_p7)
}
  0x11   :  { %s426_s22 = smov 128   ;;  %s427_s23 = smov 8  }
  0x12   :  { %22 = dma.hbm_to_vmem [thread:$0]  %s498_s0, 256, %s17_s13, [#allocation4], %s426_s22, %s426_s22, %s427_s23  }
  0x13   :  { %s428_s26 = smov [#allocation6]   ;;  %s375_s30 = scalar_lea.hbm %s499_s1, 2048 }
  0x14   :  { %s28_s27 = sshll.u32 %s428_s26, 4  ;;  %p376_p8 = scmp.ne.s32.totalorder %s499_s1, %s375_s30  ;;  %s29_s27 = int_to_ptr.vmem [resolvable:$true] %s28_s27 }
  0x15   :  { %p379_p9 = scmp.lt.u32.totalorder %s375_s30, %s499_s1 }
  0x17   :  { %p381_p10 = pnand %p379_p9, %p376_p8 }
  0x19   :  { %384 = shalt.err (!%p381_p10)
}
  0x1a   :  { %s385_s8 = scalar_lea.vmem %s29_s27, 2048  ;;  %p390_p12 = scmp.lt.s32.totalorder %s29_s27, %s29_s27 }
  0x1b   :  { %p386_p11 = scmp.ne.s32.totalorder %s29_s27, %s385_s8  ;;  %p391_p13 = scmp.lt.s32.totalorder %s385_s8, %s385_s8 }
  0x1d   :  { %p392_p0 = por %p391_p13, %p390_p12 }
  0x1f   :  { %p393_p1 = pnand %p392_p0, %p386_p11 }
  0x21   :  { %396 = shalt.err (!%p393_p1)
}
  0x22   :  { %s429_s0 = smov 512   ;;  %s430_s9 = smov 32  }
  0x23   :  { %34 = dma.hbm_to_vmem [thread:$0]  %s499_s1, 2048, %s29_s27, [#allocation7], %s429_s0, %s429_s0, %s430_s9  }
  0x24   :  { %419 = dma.done.wait [#allocation4], 256  }
  0x25   :  { %420 = vsyncadd [#allocation4], 4294967040 }
  0x26   :  { %421 = dma.done.wait [#allocation7], 2048  }
  0x27   :  { %422 = vsyncadd [#allocation7], 4294965248  ;;  %v431_v0 = vmov 0.0   ;;  %v66_v1 = vld [vmem:[#allocation6 + $0x8] sm:$0xff]  ;;  %v68_v3 = vld [vmem:[#allocation6 + $0x18] sm:$0xff]  ;;  %vm81_vm0 = vcmask 261120   ;;  %v271_v27 = vlaneseq }
  0x28   :  { %152 = vmatprep.mubr.f32.mxu0 %v431_v0  ;;  %229 = vmatprep.mubr.f32.mxu1 %v431_v0  ;;  %v70_v2 = vld [vmem:[#allocation6 + $0x28] sm:$0xff]  ;;  %v72_v5 = vld [vmem:[#allocation6 + $0x38] sm:$0xff]  ;;  %v65_v6 = vld [vmem:[#allocation6] sm:$0xff] }
  0x29   :  { %v329_v4 = vpack.c.bf16 %v70_v2, %v66_v1  ;;  %v69_v7 = vld [vmem:[#allocation6 + $0x20] sm:$0xff]  ;;  %v337_v8 = vpack.c.bf16 %v72_v5, %v68_v3  ;;  %v67_v10 = vld [vmem:[#allocation6 + $0x10] sm:$0xff]  ;;  %v74_v12 = vld [vmem:[#allocation6 + $0x48] sm:$0xff]  ;;  %v272_v28 = vshrl.u32 %v271_v27, 7 }
  0x2a   :  { %v331_v9 = vpack.c.bf16 %v69_v7, %v65_v6  ;;  %v71_v11 = vld [vmem:[#allocation6 + $0x30] sm:$0xff]  ;;  %v78_v14 = vld [vmem:[#allocation6 + $0x68] sm:$0xff]  ;;  %v76_v15 = vld [vmem:[#allocation6 + $0x58] sm:$0xff] }
  0x2b   :  { %330 = vmatprep.subr.bf16.mxu0 %v329_v4  ;;  %v339_v13 = vpack.c.bf16 %v71_v11, %v67_v10  ;;  %v80_v16 = vld [vmem:[#allocation6 + $0x78] sm:$0xff]  ;;  %338 = vmatprep.subr.bf16.mxu1 %v337_v8  ;;  %v333_v17 = vpack.c.bf16 %v78_v14, %v74_v12  ;;  %v73_v19 = vld [vmem:[#allocation6 + $0x40] sm:$0xff]  ;;  %v75_v21 = vld [vmem:[#allocation6 + $0x50] sm:$0xff]  ;;  %v273_v29 = vsub.s32 0, %v272_v28  ;;  %v281_v31 = vsub.s32 2, %v272_v28 }
  0x2c   :  { %332 = vmatpush1.bf16.msra.mxu0 %v331_v9  ;;  %v341_v18 = vpack.c.bf16 %v80_v16, %v76_v15  ;;  %v77_v20 = vld [vmem:[#allocation6 + $0x60] sm:$0xff]  ;;  %v79_v23 = vld [vmem:[#allocation6 + $0x70] sm:$0xff]  ;;  %v64_v26 = vld [vmem:[#allocation3 + $0x8] sm:$0xff]  ;;  %v277_v32 = vsub.s32 1, %v272_v28  ;;  %v285_v33 = vsub.s32 3, %v272_v28 }
  0x2d   :  { %340 = vmatpush1.bf16.msra.mxu1 %v339_v13  ;;  %v335_v22 = vpack.c.bf16 %v77_v20, %v73_v19  ;;  %334 = vmatprep.subr.bf16.mxu0 %v333_v17  ;;  %v343_v24 = vpack.c.bf16 %v79_v23, %v75_v21  ;;  %v63_v25 = vld [vmem:[#allocation3] sm:$0xff] }
  0x2e   :  { %342 = vmatprep.subr.bf16.mxu1 %v341_v18  ;;  %v269_v30 = vld [vmem:[%s500_s2] sm:$0xf]  ;;  %s432_s2 = smov [#allocation8]  }
  0x2f   :  { %v274_v34 = vrot.slane %v269_v30, %v273_v29  ;;  %v282_v35 = vrot.slane %v269_v30, %v281_v31  ;;  %v278_v36 = vrot.slane %v269_v30, %v277_v32  ;;  %v286_v37 = vrot.slane %v269_v30, %v285_v33  ;;  %s312_s13 = sshll.u32 %s432_s2, 4  ;;  %s313_s13 = int_to_ptr.vmem [resolvable:$true] %s312_s13 }
  0x30   :  { %336 = vmatpush1.bf16.msra.mxu0 %v335_v22  ;;  %s397_s14 = scalar_lea.vmem %s313_s13, 1024  ;;  %p402_p3 = scmp.lt.s32.totalorder %s313_s13, %s313_s13 }
  0x31   :  { %344 = vmatpush1.bf16.msra.mxu1 %v343_v24  ;;  %p398_p2 = scmp.ne.s32.totalorder %s313_s13, %s397_s14  ;;  %p403_p4 = scmp.lt.s32.totalorder %s397_s14, %s397_s14 }
  0x33   :  { %325 = vmatmul.mubr.msk.f32.vlgmr.msra.gmra.mrb[0].mxu0 %vm81_vm0, %v63_v25  ;;  %p404_p5 = por %p403_p4, %p402_p3 }
  0x34   :  { %327 = vmatmul.mubr.msk.f32.vlgmr.msra.gmra.mrb[0].mxu1 %vm81_vm0, %v63_v25  ;;  %158 = vmatprep.mubr.f32.mxu0 %v431_v0 }
  0x35   :  { %235 = vmatprep.mubr.f32.mxu1 %v431_v0  ;;  %p405_p6 = pnand %p404_p5, %p398_p2 }
  0x37   :  { %326 = vmatmul.mubr.msk.f32.gmra.mrb[2].mxu0 %vm81_vm0, %v64_v26 }
  0x38   :  { %328 = vmatmul.mubr.msk.f32.gmra.mrb[2].mxu1 %vm81_vm0, %v64_v26 }
 0x106   :  { %v154_v38 = vpop.f32.mrb[0].mxu0 }
 0x107   :  { %v291_v39 = vadd.f32 %v274_v34, %v154_v38  ;;  %v231_v40 = vpop.f32.mrb[0].mxu1  ;;  %v156_v41 = vpop.f32.mrb[1].mxu0 }
 0x108   :  { %v293_v42 = vadd.f32 %v282_v35, %v231_v40  ;;  %v292_v43 = vadd.f32 %v278_v36, %v156_v41  ;;  %v233_v44 = vpop.f32.mrb[1].mxu1 }
 0x109   :  { %299 = vst [vmem:[#allocation8] sm:$0xff] %v291_v39  ;;  %v294_v45 = vadd.f32 %v286_v37, %v233_v44 }
 0x10a   :  { %301 = vst [vmem:[#allocation8 + $0x10] sm:$0xff] %v293_v42  ;;  %300 = vst [vmem:[#allocation8 + $0x8] sm:$0xff] %v292_v43  ;;  %v160_v46 = vpop.f32.mrb[2].mxu0 }
 0x10b   :  { %302 = vst [vmem:[#allocation8 + $0x18] sm:$0xff] %v294_v45  ;;  %v295_v47 = vadd.f32 %v274_v34, %v160_v46  ;;  %v237_v48 = vpop.f32.mrb[2].mxu1  ;;  %v162_v49 = vpop.f32.mrb[3].mxu0 }
 0x10c   :  { %v297_v50 = vadd.f32 %v282_v35, %v237_v48  ;;  %v296_v51 = vadd.f32 %v278_v36, %v162_v49  ;;  %v239_v52 = vpop.f32.mrb[3].mxu1 }
 0x10d   :  { %303 = vst [vmem:[#allocation8 + $0x20] sm:$0xff] %v295_v47  ;;  %v298_v53 = vadd.f32 %v286_v37, %v239_v52 }
 0x10e   :  { %305 = vst [vmem:[#allocation8 + $0x30] sm:$0xff] %v297_v50  ;;  %304 = vst [vmem:[#allocation8 + $0x28] sm:$0xff] %v296_v51 }
 0x10f   :  { %306 = vst [vmem:[#allocation8 + $0x38] sm:$0xff] %v298_v53 }
 0x110   :  { %408 = shalt.err (!%p405_p6)
}
 0x111   :  { %s409_s17 = scalar_lea.hbm %s501_s3, 1024 }
 0x112   :  { %p410_p7 = scmp.ne.s32.totalorder %s501_s3, %s409_s17  ;;  %p413_p8 = scmp.lt.u32.totalorder %s409_s17, %s501_s3 }
 0x114   :  { %p415_p9 = pnand %p413_p8, %p410_p7 }
 0x116   :  { %418 = shalt.err (!%p415_p9)
}
 0x117   :  { %318 = dma.vmem_to_hbm [thread:$0]  %s313_s13, 1024, %s501_s3, [#allocation5], %s429_s0, %s429_s0, %s430_s9  }
 0x118   :  { %423 = dma.done.wait [#allocation5], 1024  }
 0x119   :  { %424 = vsyncadd [#allocation5], 4294966272 }
 0x11a   :  { %322 = vsyncpa [#allocation4], 1 }
 0x11b   :  { %323 = vsyncpa [#allocation7], 1 }
 0x11c   :  { %324 = vsyncpa [#allocation5], 1 }

</bundles_post_ra>
